<compile_context>
chip_gen: v5e
topology: v5e:2x2
jax: 0.10.0
libtpu: 0.0.40
codegen_flags: <defaults>
</compile_context>

<pallas_src>
import jax
import jax.numpy as jnp
from jax.experimental import pallas as pl
from jax.experimental.pallas import tpu as pltpu


# ----------------------------------------------------------------------------
# Pallas kernel: fused bidirectional LSTM layer recurrence (single invocation).
# ----------------------------------------------------------------------------
def _bilstm_layer_kernel(gx_ref, whh_ref, h0_ref, c0_ref, y_ref, hN_ref, cN_ref):
    """gx_ref : (T, B, 8H)  precomputed input gates + fused bias; columns are
                gate-major in kernel order [i, f, o, g], each gate block
                direction-interleaved [dir_fwd | dir_rev]; the reverse half is
                already time-reversed (row s of the reverse half = input x[T-1-s]).
       whh_ref: (2H, 8H)    block-diagonal recurrent weights, same column layout.
       h0_ref : (B, 2H)     [h0_fwd | h0_rev];  c0_ref likewise.
       y_ref  : (T, B, 2H)  fused layer output [fwd | rev].
       hN_ref : (B, 2H)     final hidden state; cN_ref final cell state."""
    T = gx_ref.shape[0]
    H2 = h0_ref.shape[-1]            # 2H (both directions)
    H = H2 // 2

    whh = whh_ref[...]               # (2H, 8H) loop-invariant, stays resident
    h_cat = h0_ref[...].astype(jnp.float32)    # (B, 2H)
    c_cat = c0_ref[...].astype(jnp.float32)    # (B, 2H)

    # Time loop fully unrolled: indices static, h/c live in vregs, LLO scheduler
    # sees the whole dependence chain.
    for s in range(T):
        gates = gx_ref[s] + jnp.dot(h_cat, whh,
                                    preferred_element_type=jnp.float32)   # (B, 8H)
        # one sigmoid over the contiguous [i | f | o] slab, one tanh for g
        sg = jax.nn.sigmoid(gates[:, 0:3 * H2])                           # (B, 6H)
        i_g = sg[:, 0 * H2:1 * H2]
        f_g = sg[:, 1 * H2:2 * H2]
        o_g = sg[:, 2 * H2:3 * H2]
        g_g = jnp.tanh(gates[:, 3 * H2:4 * H2])
        c_cat = f_g * c_cat + i_g * g_g
        h_cat = o_g * jnp.tanh(c_cat)
        # forward half belongs to time s, reverse half to time T-1-s
        y_ref[s, :, 0:H] = h_cat[:, 0:H].astype(y_ref.dtype)
        y_ref[T - 1 - s, :, H:H2] = h_cat[:, H:H2].astype(y_ref.dtype)

    # final states written exactly once
    hN_ref[...] = h_cat.astype(hN_ref.dtype)
    cN_ref[...] = c_cat.astype(cN_ref.dtype)


# ----------------------------------------------------------------------------
# Parameter preparation (done ONCE, outside the jitted forward).
# ----------------------------------------------------------------------------
def _reorder_gates(w, H):
    """torch gate order [i, f, g, o] -> kernel order [i, f, o, g] along the
    leading 4H axis (works for (4H, D) weights and (4H,) biases)."""
    return jnp.concatenate([w[:2 * H], w[3 * H:4 * H], w[2 * H:3 * H]], axis=0)


def _prepare_layer(p_fwd, p_rev, hidden_size):
    H = hidden_size
    wih_f = _reorder_gates(p_fwd["wih"], H)          # (4H, D_in), rows [i,f,o,g]
    wih_r = _reorder_gates(p_rev["wih"], H)
    whh_f = _reorder_gates(p_fwd["whh"], H)          # (4H, H)
    whh_r = _reorder_gates(p_rev["whh"], H)
    b_f = _reorder_gates(p_fwd["bih"] + p_fwd["bhh"], H).reshape(4, H)
    b_r = _reorder_gates(p_rev["bih"] + p_rev["bhh"], H).reshape(4, H)

    # input projection weights, both directions side by side: (D_in, 8H)
    wih_cat = jnp.concatenate([wih_f.T, wih_r.T], axis=1)
    # fused bias, gate-major & direction-interleaved: (1, 1, 8H)
    b_int = jnp.stack([b_f, b_r], axis=1).reshape(1, 1, 8 * H)
    # block-diagonal recurrent weight (2H, 8H), same interleaved column layout
    wf = whh_f.T.reshape(H, 4, H)
    wr = whh_r.T.reshape(H, 4, H)
    zz = jnp.zeros_like(wf)
    top = jnp.stack([wf, zz], axis=2).reshape(H, 8 * H)    # rows: h_fwd inputs
    bot = jnp.stack([zz, wr], axis=2).reshape(H, 8 * H)    # rows: h_rev inputs
    whh_blk = jnp.concatenate([top, bot], axis=0)
    return dict(wih_cat=wih_cat, b_int=b_int, whh_blk=whh_blk)


def prepare_encoder_params(params, num_layers, hidden_size):
    return [_prepare_layer(params[(l, 0)], params[(l, 1)], hidden_size)
            for l in range(num_layers)]


# ----------------------------------------------------------------------------
# One fused bidirectional layer: hoisted input projection + Pallas recurrence.
# ----------------------------------------------------------------------------
def _bilstm_layer(prep, x_tm, h0_cat, c0_cat):
    """x_tm: (T, B, D_in) time-major.  Returns (y (T,B,2H), hN (B,2H), cN (B,2H))."""
    T, B, _ = x_tm.shape
    H2 = h0_cat.shape[-1]
    H = H2 // 2
    G = 4 * H2                                            # 8H gate columns

    # Hoisted input projection: ONE large matmul for all T steps & both dirs.
    gx_both = jnp.einsum("tbd,dg->tbg", x_tm, prep["wih_cat"],
                         preferred_element_type=jnp.float32)      # (T, B, 8H)
    gf = gx_both[:, :, :4 * H].reshape(T, B, 4, H)                # forward gates
    gr = gx_both[::-1, :, 4 * H:].reshape(T, B, 4, H)             # reverse, time-flipped
    gx = jnp.stack([gf, gr], axis=3).reshape(T, B, G) + prep["b_int"]

    vmem = pl.BlockSpec(memory_space=pltpu.MemorySpace.VMEM)
    return pl.pallas_call(
        _bilstm_layer_kernel,
        out_shape=(jax.ShapeDtypeStruct((T, B, H2), jnp.float32),
                   jax.ShapeDtypeStruct((B, H2), jnp.float32),
                   jax.ShapeDtypeStruct((B, H2), jnp.float32)),
        in_specs=[vmem, vmem, vmem, vmem],
        out_specs=(vmem, vmem, vmem),
    )(gx, prep["whh_blk"], h0_cat, c0_cat)


def encoder_forward(prepared, input_seq, h_0, c_0):
    """input_seq: (B, T, input_size) batch-first.  Returns (output, h, c) like nn.LSTM."""
    H = h_0.shape[-1]
    x = jnp.transpose(input_seq, (1, 0, 2))               # time-major (T, B, D)
    h_out, c_out = [], []
    for layer, prep in enumerate(prepared):
        h0_cat = jnp.concatenate([h_0[2 * layer], h_0[2 * layer + 1]], axis=-1)
        c0_cat = jnp.concatenate([c_0[2 * layer], c_0[2 * layer + 1]], axis=-1)
        x, hN, cN = _bilstm_layer(prep, x, h0_cat, c0_cat)   # x is now (T, B, 2H)
        h_out += [hN[:, :H], hN[:, H:]]
        c_out += [cN[:, :H], cN[:, H:]]
    output = jnp.transpose(x, (1, 0, 2))                   # back to (B, T, 2H)
    return output, jnp.stack(h_out, axis=0), jnp.stack(c_out, axis=0)


# ----------------------------------------------------------------------------
# Parameter init (torch-style shapes) and pure-JAX reference for correctness.
# ----------------------------------------------------------------------------
def init_encoder_params(key, input_size, hidden_size, num_layers):
    params = {}
    k = 1.0 / jnp.sqrt(jnp.float32(hidden_size))
    for layer in range(num_layers):
        d_in = input_size if layer == 0 else 2 * hidden_size
        for direction in range(2):
            key, k1, k2, k3, k4 = jax.random.split(key, 5)
            params[(layer, direction)] = dict(
                wih=jax.random.uniform(k1, (4 * hidden_size, d_in), jnp.float32, -k, k),
                whh=jax.random.uniform(k2, (4 * hidden_size, hidden_size), jnp.float32, -k, k),
                bih=jax.random.uniform(k3, (4 * hidden_size,), jnp.float32, -k, k),
                bhh=jax.random.uniform(k4, (4 * hidden_size,), jnp.float32, -k, k),
            )
    return params


def _lstm_dir_ref(x, wih, whh, bih, bhh, h0, c0, reverse):
    T = x.shape[0]
    H = h0.shape[-1]
    h, c = h0, c0
    out = [None] * T
    order = range(T - 1, -1, -1) if reverse else range(T)
    for t in order:
        g = x[t] @ wih.T + bih + h @ whh.T + bhh
        i = jax.nn.sigmoid(g[:, :H])
        f = jax.nn.sigmoid(g[:, H:2 * H])
        gg = jnp.tanh(g[:, 2 * H:3 * H])
        o = jax.nn.sigmoid(g[:, 3 * H:])
        c = f * c + i * gg
        h = o * jnp.tanh(c)
        out[t] = h
    return jnp.stack(out, 0), h, c


def encoder_forward_ref(params, input_seq, h_0, c_0, num_layers):
    x = jnp.transpose(input_seq, (1, 0, 2))
    h_list, c_list = [], []
    for layer in range(num_layers):
        ys = []
        for direction in range(2):
            p = params[(layer, direction)]
            y, hN, cN = _lstm_dir_ref(x, p["wih"], p["whh"], p["bih"], p["bhh"],
                                      h_0[layer * 2 + direction],
                                      c_0[layer * 2 + direction],
                                      reverse=(direction == 1))
            ys.append(y)
            h_list.append(hN)
            c_list.append(cN)
        x = jnp.concatenate(ys, axis=-1)
    return jnp.transpose(x, (1, 0, 2)), jnp.stack(h_list, 0), jnp.stack(c_list, 0)


# ----------------------------------------------------------------------------
if __name__ == "__main__":
    input_size, hidden_size, num_layers = 16, 32, 2
    batch_size, seq_len = 2, 8
    num_directions = 2

    root = jax.random.PRNGKey(0)
    k_par, k_x, k_h, k_c = jax.random.split(root, 4)

    params = init_encoder_params(k_par, input_size, hidden_size, num_layers)
    prepared = prepare_encoder_params(params, num_layers, hidden_size)

    x = jax.random.normal(k_x, (batch_size, seq_len, input_size), jnp.float32)
    # The PyTorch forward draws fresh randn h_0/c_0 each call; we draw them
    # deterministically from the JAX PRNG (same shapes / distribution).
    h_0 = jax.random.normal(k_h, (num_directions * num_layers, batch_size, hidden_size),
                            jnp.float32)
    c_0 = jax.random.normal(k_c, (num_directions * num_layers, batch_size, hidden_size),
                            jnp.float32)

    forward = jax.jit(encoder_forward)
    output, h, c = forward(prepared, x, h_0, c_0)
    jax.block_until_ready((output, h, c))

    # shapes match nn.LSTM(batch_first=True, bidirectional=True)
    assert output.shape == (batch_size, seq_len, num_directions * hidden_size)
    assert h.shape == (num_directions * num_layers, batch_size, hidden_size)
    assert c.shape == (num_directions * num_layers, batch_size, hidden_size)

    # numerical check against pure-JAX reference
    o_ref, h_ref, c_ref = encoder_forward_ref(params, x, h_0, c_0, num_layers)
    assert jnp.allclose(output, o_ref, atol=1e-4, rtol=1e-4)
    assert jnp.allclose(h, h_ref, atol=1e-4, rtol=1e-4)
    assert jnp.allclose(c, c_ref, atol=1e-4, rtol=1e-4)

    print("KERNEL_OK")
</pallas_src>

<mosaic_0001>
module attributes {stable_mosaic.version = 11 : i64} {
  func.func @_bilstm_layer_kernel(%arg0: memref<8x2x256xf32, #tpu.memory_space<vmem>>, %arg1: memref<64x256xf32, #tpu.memory_space<vmem>>, %arg2: memref<2x64xf32, #tpu.memory_space<vmem>>, %arg3: memref<2x64xf32, #tpu.memory_space<vmem>>, %arg4: memref<8x2x64xf32, #tpu.memory_space<vmem>>, %arg5: memref<2x64xf32, #tpu.memory_space<vmem>>, %arg6: memref<2x64xf32, #tpu.memory_space<vmem>>) attributes {dimension_semantics = [], scalar_prefetch = 0 : i64, scratch_operands = 0 : i64, tpu.core_type = #tpu.core_type<tc>} {
    %c0 = arith.constant 0 : index
    %c0_0 = arith.constant 0 : index
    %0 = vector.load %arg1[%c0, %c0_0] : memref<64x256xf32, #tpu.memory_space<vmem>>, vector<64x256xf32>
    %c0_1 = arith.constant 0 : index
    %c0_2 = arith.constant 0 : index
    %1 = vector.load %arg2[%c0_1, %c0_2] : memref<2x64xf32, #tpu.memory_space<vmem>>, vector<2x64xf32>
    %c0_3 = arith.constant 0 : index
    %c0_4 = arith.constant 0 : index
    %2 = vector.load %arg3[%c0_3, %c0_4] : memref<2x64xf32, #tpu.memory_space<vmem>>, vector<2x64xf32>
    %c0_5 = arith.constant 0 : index
    %c0_6 = arith.constant 0 : index
    %c0_7 = arith.constant 0 : index
    %3 = vector.load %arg0[%c0_5, %c0_6, %c0_7] : memref<8x2x256xf32, #tpu.memory_space<vmem>>, vector<1x2x256xf32>
    %4 = vector.shape_cast %3 : vector<1x2x256xf32> to vector<2x256xf32>
    %cst = arith.constant dense<0.000000e+00> : vector<2x256xf32>
    %5 = tpu.matmul %1, %0, %cst {dimension_numbers = #tpu.dot_dimension_numbers<[1], [0], [0], [1], [0, 0, 1, 1], [], []>} : vector<2x64xf32>, vector<64x256xf32>, vector<2x256xf32> -> vector<2x256xf32>
    %6 = arith.addf %4, %5 : vector<2x256xf32>
    %7 = vector.extract_strided_slice %6 {offsets = [0, 0], sizes = [2, 192], strides = [1, 1]} : vector<2x256xf32> to vector<2x192xf32>
    %8 = arith.negf %7 : vector<2x192xf32>
    %9 = math.exp %8 : vector<2x192xf32>
    %cst_8 = arith.constant 1.000000e+00 : f32
    %10 = vector.broadcast %cst_8 : f32 to vector<2x192xf32>
    %11 = arith.addf %10, %9 : vector<2x192xf32>
    %12 = arith.divf %10, %11 : vector<2x192xf32>
    %13 = vector.extract_strided_slice %12 {offsets = [0, 0], sizes = [2, 64], strides = [1, 1]} : vector<2x192xf32> to vector<2x64xf32>
    %14 = vector.extract_strided_slice %12 {offsets = [0, 64], sizes = [2, 64], strides = [1, 1]} : vector<2x192xf32> to vector<2x64xf32>
    %15 = vector.extract_strided_slice %12 {offsets = [0, 128], sizes = [2, 64], strides = [1, 1]} : vector<2x192xf32> to vector<2x64xf32>
    %16 = vector.extract_strided_slice %6 {offsets = [0, 192], sizes = [2, 64], strides = [1, 1]} : vector<2x256xf32> to vector<2x64xf32>
    %17 = math.tanh %16 : vector<2x64xf32>
    %18 = arith.mulf %14, %2 : vector<2x64xf32>
    %19 = arith.mulf %13, %17 : vector<2x64xf32>
    %20 = arith.addf %18, %19 : vector<2x64xf32>
    %21 = math.tanh %20 : vector<2x64xf32>
    %22 = arith.mulf %15, %21 : vector<2x64xf32>
    %23 = vector.extract_strided_slice %22 {offsets = [0, 0], sizes = [2, 32], strides = [1, 1]} : vector<2x64xf32> to vector<2x32xf32>
    %c0_9 = arith.constant 0 : index
    %c0_10 = arith.constant 0 : index
    %c0_11 = arith.constant 0 : index
    %24 = vector.load %arg4[%c0_9, %c0_10, %c0_11] : memref<8x2x64xf32, #tpu.memory_space<vmem>>, vector<1x2x32xf32>
    %25 = vector.shape_cast %24 : vector<1x2x32xf32> to vector<2x32xf32>
    %26 = vector.shape_cast %23 : vector<2x32xf32> to vector<1x2x32xf32>
    tpu.vector_store %arg4[%c0_9, %c0_10, %c0_11], %26 {strides = array<i32>} : memref<8x2x64xf32, #tpu.memory_space<vmem>>, vector<1x2x32xf32>,
    %27 = vector.extract_strided_slice %22 {offsets = [0, 32], sizes = [2, 32], strides = [1, 1]} : vector<2x64xf32> to vector<2x32xf32>
    %c7 = arith.constant 7 : index
    %c0_12 = arith.constant 0 : index
    %c32 = arith.constant 32 : index
    %28 = vector.load %arg4[%c7, %c0_12, %c32] : memref<8x2x64xf32, #tpu.memory_space<vmem>>, vector<1x2x32xf32>
    %29 = vector.shape_cast %28 : vector<1x2x32xf32> to vector<2x32xf32>
    %30 = vector.shape_cast %27 : vector<2x32xf32> to vector<1x2x32xf32>
    tpu.vector_store %arg4[%c7, %c0_12, %c32], %30 {strides = array<i32>} : memref<8x2x64xf32, #tpu.memory_space<vmem>>, vector<1x2x32xf32>,
    %c1 = arith.constant 1 : index
    %c0_13 = arith.constant 0 : index
    %c0_14 = arith.constant 0 : index
    %31 = vector.load %arg0[%c1, %c0_13, %c0_14] : memref<8x2x256xf32, #tpu.memory_space<vmem>>, vector<1x2x256xf32>
    %32 = vector.shape_cast %31 : vector<1x2x256xf32> to vector<2x256xf32>
    %cst_15 = arith.constant dense<0.000000e+00> : vector<2x256xf32>
    %33 = tpu.matmul %22, %0, %cst_15 {dimension_numbers = #tpu.dot_dimension_numbers<[1], [0], [0], [1], [0, 0, 1, 1], [], []>} : vector<2x64xf32>, vector<64x256xf32>, vector<2x256xf32> -> vector<2x256xf32>
    %34 = arith.addf %32, %33 : vector<2x256xf32>
    %35 = vector.extract_strided_slice %34 {offsets = [0, 0], sizes = [2, 192], strides = [1, 1]} : vector<2x256xf32> to vector<2x192xf32>
    %36 = arith.negf %35 : vector<2x192xf32>
    %37 = math.exp %36 : vector<2x192xf32>
    %cst_16 = arith.constant 1.000000e+00 : f32
    %38 = vector.broadcast %cst_16 : f32 to vector<2x192xf32>
    %39 = arith.addf %38, %37 : vector<2x192xf32>
    %40 = arith.divf %38, %39 : vector<2x192xf32>
    %41 = vector.extract_strided_slice %40 {offsets = [0, 0], sizes = [2, 64], strides = [1, 1]} : vector<2x192xf32> to vector<2x64xf32>
    %42 = vector.extract_strided_slice %40 {offsets = [0, 64], sizes = [2, 64], strides = [1, 1]} : vector<2x192xf32> to vector<2x64xf32>
    %43 = vector.extract_strided_slice %40 {offsets = [0, 128], sizes = [2, 64], strides = [1, 1]} : vector<2x192xf32> to vector<2x64xf32>
    %44 = vector.extract_strided_slice %34 {offsets = [0, 192], sizes = [2, 64], strides = [1, 1]} : vector<2x256xf32> to vector<2x64xf32>
    %45 = math.tanh %44 : vector<2x64xf32>
    %46 = arith.mulf %42, %20 : vector<2x64xf32>
    %47 = arith.mulf %41, %45 : vector<2x64xf32>
    %48 = arith.addf %46, %47 : vector<2x64xf32>
    %49 = math.tanh %48 : vector<2x64xf32>
    %50 = arith.mulf %43, %49 : vector<2x64xf32>
    %51 = vector.extract_strided_slice %50 {offsets = [0, 0], sizes = [2, 32], strides = [1, 1]} : vector<2x64xf32> to vector<2x32xf32>
    %c1_17 = arith.constant 1 : index
    %c0_18 = arith.constant 0 : index
    %c0_19 = arith.constant 0 : index
    %52 = vector.load %arg4[%c1_17, %c0_18, %c0_19] : memref<8x2x64xf32, #tpu.memory_space<vmem>>, vector<1x2x32xf32>
    %53 = vector.shape_cast %52 : vector<1x2x32xf32> to vector<2x32xf32>
    %54 = vector.shape_cast %51 : vector<2x32xf32> to vector<1x2x32xf32>
    tpu.vector_store %arg4[%c1_17, %c0_18, %c0_19], %54 {strides = array<i32>} : memref<8x2x64xf32, #tpu.memory_space<vmem>>, vector<1x2x32xf32>,
    %55 = vector.extract_strided_slice %50 {offsets = [0, 32], sizes = [2, 32], strides = [1, 1]} : vector<2x64xf32> to vector<2x32xf32>
    %c6 = arith.constant 6 : index
    %c0_20 = arith.constant 0 : index
    %c32_21 = arith.constant 32 : index
    %56 = vector.load %arg4[%c6, %c0_20, %c32_21] : memref<8x2x64xf32, #tpu.memory_space<vmem>>, vector<1x2x32xf32>
    %57 = vector.shape_cast %56 : vector<1x2x32xf32> to vector<2x32xf32>
    %58 = vector.shape_cast %55 : vector<2x32xf32> to vector<1x2x32xf32>
    tpu.vector_store %arg4[%c6, %c0_20, %c32_21], %58 {strides = array<i32>} : memref<8x2x64xf32, #tpu.memory_space<vmem>>, vector<1x2x32xf32>,
    %c2 = arith.constant 2 : index
    %c0_22 = arith.constant 0 : index
    %c0_23 = arith.constant 0 : index
    %59 = vector.load %arg0[%c2, %c0_22, %c0_23] : memref<8x2x256xf32, #tpu.memory_space<vmem>>, vector<1x2x256xf32>
    %60 = vector.shape_cast %59 : vector<1x2x256xf32> to vector<2x256xf32>
    %cst_24 = arith.constant dense<0.000000e+00> : vector<2x256xf32>
    %61 = tpu.matmul %50, %0, %cst_24 {dimension_numbers = #tpu.dot_dimension_numbers<[1], [0], [0], [1], [0, 0, 1, 1], [], []>} : vector<2x64xf32>, vector<64x256xf32>, vector<2x256xf32> -> vector<2x256xf32>
    %62 = arith.addf %60, %61 : vector<2x256xf32>
    %63 = vector.extract_strided_slice %62 {offsets = [0, 0], sizes = [2, 192], strides = [1, 1]} : vector<2x256xf32> to vector<2x192xf32>
    %64 = arith.negf %63 : vector<2x192xf32>
    %65 = math.exp %64 : vector<2x192xf32>
    %cst_25 = arith.constant 1.000000e+00 : f32
    %66 = vector.broadcast %cst_25 : f32 to vector<2x192xf32>
    %67 = arith.addf %66, %65 : vector<2x192xf32>
    %68 = arith.divf %66, %67 : vector<2x192xf32>
    %69 = vector.extract_strided_slice %68 {offsets = [0, 0], sizes = [2, 64], strides = [1, 1]} : vector<2x192xf32> to vector<2x64xf32>
    %70 = vector.extract_strided_slice %68 {offsets = [0, 64], sizes = [2, 64], strides = [1, 1]} : vector<2x192xf32> to vector<2x64xf32>
    %71 = vector.extract_strided_slice %68 {offsets = [0, 128], sizes = [2, 64], strides = [1, 1]} : vector<2x192xf32> to vector<2x64xf32>
    %72 = vector.extract_strided_slice %62 {offsets = [0, 192], sizes = [2, 64], strides = [1, 1]} : vector<2x256xf32> to vector<2x64xf32>
    %73 = math.tanh %72 : vector<2x64xf32>
    %74 = arith.mulf %70, %48 : vector<2x64xf32>
    %75 = arith.mulf %69, %73 : vector<2x64xf32>
    %76 = arith.addf %74, %75 : vector<2x64xf32>
    %77 = math.tanh %76 : vector<2x64xf32>
    %78 = arith.mulf %71, %77 : vector<2x64xf32>
    %79 = vector.extract_strided_slice %78 {offsets = [0, 0], sizes = [2, 32], strides = [1, 1]} : vector<2x64xf32> to vector<2x32xf32>
    %c2_26 = arith.constant 2 : index
    %c0_27 = arith.constant 0 : index
    %c0_28 = arith.constant 0 : index
    %80 = vector.load %arg4[%c2_26, %c0_27, %c0_28] : memref<8x2x64xf32, #tpu.memory_space<vmem>>, vector<1x2x32xf32>
    %81 = vector.shape_cast %80 : vector<1x2x32xf32> to vector<2x32xf32>
    %82 = vector.shape_cast %79 : vector<2x32xf32> to vector<1x2x32xf32>
    tpu.vector_store %arg4[%c2_26, %c0_27, %c0_28], %82 {strides = array<i32>} : memref<8x2x64xf32, #tpu.memory_space<vmem>>, vector<1x2x32xf32>,
    %83 = vector.extract_strided_slice %78 {offsets = [0, 32], sizes = [2, 32], strides = [1, 1]} : vector<2x64xf32> to vector<2x32xf32>
    %c5 = arith.constant 5 : index
    %c0_29 = arith.constant 0 : index
    %c32_30 = arith.constant 32 : index
    %84 = vector.load %arg4[%c5, %c0_29, %c32_30] : memref<8x2x64xf32, #tpu.memory_space<vmem>>, vector<1x2x32xf32>
    %85 = vector.shape_cast %84 : vector<1x2x32xf32> to vector<2x32xf32>
    %86 = vector.shape_cast %83 : vector<2x32xf32> to vector<1x2x32xf32>
    tpu.vector_store %arg4[%c5, %c0_29, %c32_30], %86 {strides = array<i32>} : memref<8x2x64xf32, #tpu.memory_space<vmem>>, vector<1x2x32xf32>,
    %c3 = arith.constant 3 : index
    %c0_31 = arith.constant 0 : index
    %c0_32 = arith.constant 0 : index
    %87 = vector.load %arg0[%c3, %c0_31, %c0_32] : memref<8x2x256xf32, #tpu.memory_space<vmem>>, vector<1x2x256xf32>
    %88 = vector.shape_cast %87 : vector<1x2x256xf32> to vector<2x256xf32>
    %cst_33 = arith.constant dense<0.000000e+00> : vector<2x256xf32>
    %89 = tpu.matmul %78, %0, %cst_33 {dimension_numbers = #tpu.dot_dimension_numbers<[1], [0], [0], [1], [0, 0, 1, 1], [], []>} : vector<2x64xf32>, vector<64x256xf32>, vector<2x256xf32> -> vector<2x256xf32>
    %90 = arith.addf %88, %89 : vector<2x256xf32>
    %91 = vector.extract_strided_slice %90 {offsets = [0, 0], sizes = [2, 192], strides = [1, 1]} : vector<2x256xf32> to vector<2x192xf32>
    %92 = arith.negf %91 : vector<2x192xf32>
    %93 = math.exp %92 : vector<2x192xf32>
    %cst_34 = arith.constant 1.000000e+00 : f32
    %94 = vector.broadcast %cst_34 : f32 to vector<2x192xf32>
    %95 = arith.addf %94, %93 : vector<2x192xf32>
    %96 = arith.divf %94, %95 : vector<2x192xf32>
    %97 = vector.extract_strided_slice %96 {offsets = [0, 0], sizes = [2, 64], strides = [1, 1]} : vector<2x192xf32> to vector<2x64xf32>
    %98 = vector.extract_strided_slice %96 {offsets = [0, 64], sizes = [2, 64], strides = [1, 1]} : vector<2x192xf32> to vector<2x64xf32>
    %99 = vector.extract_strided_slice %96 {offsets = [0, 128], sizes = [2, 64], strides = [1, 1]} : vector<2x192xf32> to vector<2x64xf32>
    %100 = vector.extract_strided_slice %90 {offsets = [0, 192], sizes = [2, 64], strides = [1, 1]} : vector<2x256xf32> to vector<2x64xf32>
    %101 = math.tanh %100 : vector<2x64xf32>
    %102 = arith.mulf %98, %76 : vector<2x64xf32>
    %103 = arith.mulf %97, %101 : vector<2x64xf32>
    %104 = arith.addf %102, %103 : vector<2x64xf32>
    %105 = math.tanh %104 : vector<2x64xf32>
    %106 = arith.mulf %99, %105 : vector<2x64xf32>
    %107 = vector.extract_strided_slice %106 {offsets = [0, 0], sizes = [2, 32], strides = [1, 1]} : vector<2x64xf32> to vector<2x32xf32>
    %c3_35 = arith.constant 3 : index
    %c0_36 = arith.constant 0 : index
    %c0_37 = arith.constant 0 : index
    %108 = vector.load %arg4[%c3_35, %c0_36, %c0_37] : memref<8x2x64xf32, #tpu.memory_space<vmem>>, vector<1x2x32xf32>
    %109 = vector.shape_cast %108 : vector<1x2x32xf32> to vector<2x32xf32>
    %110 = vector.shape_cast %107 : vector<2x32xf32> to vector<1x2x32xf32>
    tpu.vector_store %arg4[%c3_35, %c0_36, %c0_37], %110 {strides = array<i32>} : memref<8x2x64xf32, #tpu.memory_space<vmem>>, vector<1x2x32xf32>,
    %111 = vector.extract_strided_slice %106 {offsets = [0, 32], sizes = [2, 32], strides = [1, 1]} : vector<2x64xf32> to vector<2x32xf32>
    %c4 = arith.constant 4 : index
    %c0_38 = arith.constant 0 : index
    %c32_39 = arith.constant 32 : index
    %112 = vector.load %arg4[%c4, %c0_38, %c32_39] : memref<8x2x64xf32, #tpu.memory_space<vmem>>, vector<1x2x32xf32>
    %113 = vector.shape_cast %112 : vector<1x2x32xf32> to vector<2x32xf32>
    %114 = vector.shape_cast %111 : vector<2x32xf32> to vector<1x2x32xf32>
    tpu.vector_store %arg4[%c4, %c0_38, %c32_39], %114 {strides = array<i32>} : memref<8x2x64xf32, #tpu.memory_space<vmem>>, vector<1x2x32xf32>,
    %c4_40 = arith.constant 4 : index
    %c0_41 = arith.constant 0 : index
    %c0_42 = arith.constant 0 : index
    %115 = vector.load %arg0[%c4_40, %c0_41, %c0_42] : memref<8x2x256xf32, #tpu.memory_space<vmem>>, vector<1x2x256xf32>
    %116 = vector.shape_cast %115 : vector<1x2x256xf32> to vector<2x256xf32>
    %cst_43 = arith.constant dense<0.000000e+00> : vector<2x256xf32>
    %117 = tpu.matmul %106, %0, %cst_43 {dimension_numbers = #tpu.dot_dimension_numbers<[1], [0], [0], [1], [0, 0, 1, 1], [], []>} : vector<2x64xf32>, vector<64x256xf32>, vector<2x256xf32> -> vector<2x256xf32>
    %118 = arith.addf %116, %117 : vector<2x256xf32>
    %119 = vector.extract_strided_slice %118 {offsets = [0, 0], sizes = [2, 192], strides = [1, 1]} : vector<2x256xf32> to vector<2x192xf32>
    %120 = arith.negf %119 : vector<2x192xf32>
    %121 = math.exp %120 : vector<2x192xf32>
    %cst_44 = arith.constant 1.000000e+00 : f32
    %122 = vector.broadcast %cst_44 : f32 to vector<2x192xf32>
    %123 = arith.addf %122, %121 : vector<2x192xf32>
    %124 = arith.divf %122, %123 : vector<2x192xf32>
    %125 = vector.extract_strided_slice %124 {offsets = [0, 0], sizes = [2, 64], strides = [1, 1]} : vector<2x192xf32> to vector<2x64xf32>
    %126 = vector.extract_strided_slice %124 {offsets = [0, 64], sizes = [2, 64], strides = [1, 1]} : vector<2x192xf32> to vector<2x64xf32>
    %127 = vector.extract_strided_slice %124 {offsets = [0, 128], sizes = [2, 64], strides = [1, 1]} : vector<2x192xf32> to vector<2x64xf32>
    %128 = vector.extract_strided_slice %118 {offsets = [0, 192], sizes = [2, 64], strides = [1, 1]} : vector<2x256xf32> to vector<2x64xf32>
    %129 = math.tanh %128 : vector<2x64xf32>
    %130 = arith.mulf %126, %104 : vector<2x64xf32>
    %131 = arith.mulf %125, %129 : vector<2x64xf32>
    %132 = arith.addf %130, %131 : vector<2x64xf32>
    %133 = math.tanh %132 : vector<2x64xf32>
    %134 = arith.mulf %127, %133 : vector<2x64xf32>
    %135 = vector.extract_strided_slice %134 {offsets = [0, 0], sizes = [2, 32], strides = [1, 1]} : vector<2x64xf32> to vector<2x32xf32>
    %c4_45 = arith.constant 4 : index
    %c0_46 = arith.constant 0 : index
    %c0_47 = arith.constant 0 : index
    %136 = vector.load %arg4[%c4_45, %c0_46, %c0_47] : memref<8x2x64xf32, #tpu.memory_space<vmem>>, vector<1x2x32xf32>
    %137 = vector.shape_cast %136 : vector<1x2x32xf32> to vector<2x32xf32>
    %138 = vector.shape_cast %135 : vector<2x32xf32> to vector<1x2x32xf32>
    tpu.vector_store %arg4[%c4_45, %c0_46, %c0_47], %138 {strides = array<i32>} : memref<8x2x64xf32, #tpu.memory_space<vmem>>, vector<1x2x32xf32>,
    %139 = vector.extract_strided_slice %134 {offsets = [0, 32], sizes = [2, 32], strides = [1, 1]} : vector<2x64xf32> to vector<2x32xf32>
    %c3_48 = arith.constant 3 : index
    %c0_49 = arith.constant 0 : index
    %c32_50 = arith.constant 32 : index
    %140 = vector.load %arg4[%c3_48, %c0_49, %c32_50] : memref<8x2x64xf32, #tpu.memory_space<vmem>>, vector<1x2x32xf32>
    %141 = vector.shape_cast %140 : vector<1x2x32xf32> to vector<2x32xf32>
    %142 = vector.shape_cast %139 : vector<2x32xf32> to vector<1x2x32xf32>
    tpu.vector_store %arg4[%c3_48, %c0_49, %c32_50], %142 {strides = array<i32>} : memref<8x2x64xf32, #tpu.memory_space<vmem>>, vector<1x2x32xf32>,
    %c5_51 = arith.constant 5 : index
    %c0_52 = arith.constant 0 : index
    %c0_53 = arith.constant 0 : index
    %143 = vector.load %arg0[%c5_51, %c0_52, %c0_53] : memref<8x2x256xf32, #tpu.memory_space<vmem>>, vector<1x2x256xf32>
    %144 = vector.shape_cast %143 : vector<1x2x256xf32> to vector<2x256xf32>
    %cst_54 = arith.constant dense<0.000000e+00> : vector<2x256xf32>
    %145 = tpu.matmul %134, %0, %cst_54 {dimension_numbers = #tpu.dot_dimension_numbers<[1], [0], [0], [1], [0, 0, 1, 1], [], []>} : vector<2x64xf32>, vector<64x256xf32>, vector<2x256xf32> -> vector<2x256xf32>
    %146 = arith.addf %144, %145 : vector<2x256xf32>
    %147 = vector.extract_strided_slice %146 {offsets = [0, 0], sizes = [2, 192], strides = [1, 1]} : vector<2x256xf32> to vector<2x192xf32>
    %148 = arith.negf %147 : vector<2x192xf32>
    %149 = math.exp %148 : vector<2x192xf32>
    %cst_55 = arith.constant 1.000000e+00 : f32
    %150 = vector.broadcast %cst_55 : f32 to vector<2x192xf32>
    %151 = arith.addf %150, %149 : vector<2x192xf32>
    %152 = arith.divf %150, %151 : vector<2x192xf32>
    %153 = vector.extract_strided_slice %152 {offsets = [0, 0], sizes = [2, 64], strides = [1, 1]} : vector<2x192xf32> to vector<2x64xf32>
    %154 = vector.extract_strided_slice %152 {offsets = [0, 64], sizes = [2, 64], strides = [1, 1]} : vector<2x192xf32> to vector<2x64xf32>
    %155 = vector.extract_strided_slice %152 {offsets = [0, 128], sizes = [2, 64], strides = [1, 1]} : vector<2x192xf32> to vector<2x64xf32>
    %156 = vector.extract_strided_slice %146 {offsets = [0, 192], sizes = [2, 64], strides = [1, 1]} : vector<2x256xf32> to vector<2x64xf32>
    %157 = math.tanh %156 : vector<2x64xf32>
    %158 = arith.mulf %154, %132 : vector<2x64xf32>
    %159 = arith.mulf %153, %157 : vector<2x64xf32>
    %160 = arith.addf %158, %159 : vector<2x64xf32>
    %161 = math.tanh %160 : vector<2x64xf32>
    %162 = arith.mulf %155, %161 : vector<2x64xf32>
    %163 = vector.extract_strided_slice %162 {offsets = [0, 0], sizes = [2, 32], strides = [1, 1]} : vector<2x64xf32> to vector<2x32xf32>
    %c5_56 = arith.constant 5 : index
    %c0_57 = arith.constant 0 : index
    %c0_58 = arith.constant 0 : index
    %164 = vector.load %arg4[%c5_56, %c0_57, %c0_58] : memref<8x2x64xf32, #tpu.memory_space<vmem>>, vector<1x2x32xf32>
    %165 = vector.shape_cast %164 : vector<1x2x32xf32> to vector<2x32xf32>
    %166 = vector.shape_cast %163 : vector<2x32xf32> to vector<1x2x32xf32>
    tpu.vector_store %arg4[%c5_56, %c0_57, %c0_58], %166 {strides = array<i32>} : memref<8x2x64xf32, #tpu.memory_space<vmem>>, vector<1x2x32xf32>,
    %167 = vector.extract_strided_slice %162 {offsets = [0, 32], sizes = [2, 32], strides = [1, 1]} : vector<2x64xf32> to vector<2x32xf32>
    %c2_59 = arith.constant 2 : index
    %c0_60 = arith.constant 0 : index
    %c32_61 = arith.constant 32 : index
    %168 = vector.load %arg4[%c2_59, %c0_60, %c32_61] : memref<8x2x64xf32, #tpu.memory_space<vmem>>, vector<1x2x32xf32>
    %169 = vector.shape_cast %168 : vector<1x2x32xf32> to vector<2x32xf32>
    %170 = vector.shape_cast %167 : vector<2x32xf32> to vector<1x2x32xf32>
    tpu.vector_store %arg4[%c2_59, %c0_60, %c32_61], %170 {strides = array<i32>} : memref<8x2x64xf32, #tpu.memory_space<vmem>>, vector<1x2x32xf32>,
    %c6_62 = arith.constant 6 : index
    %c0_63 = arith.constant 0 : index
    %c0_64 = arith.constant 0 : index
    %171 = vector.load %arg0[%c6_62, %c0_63, %c0_64] : memref<8x2x256xf32, #tpu.memory_space<vmem>>, vector<1x2x256xf32>
    %172 = vector.shape_cast %171 : vector<1x2x256xf32> to vector<2x256xf32>
    %cst_65 = arith.constant dense<0.000000e+00> : vector<2x256xf32>
    %173 = tpu.matmul %162, %0, %cst_65 {dimension_numbers = #tpu.dot_dimension_numbers<[1], [0], [0], [1], [0, 0, 1, 1], [], []>} : vector<2x64xf32>, vector<64x256xf32>, vector<2x256xf32> -> vector<2x256xf32>
    %174 = arith.addf %172, %173 : vector<2x256xf32>
    %175 = vector.extract_strided_slice %174 {offsets = [0, 0], sizes = [2, 192], strides = [1, 1]} : vector<2x256xf32> to vector<2x192xf32>
    %176 = arith.negf %175 : vector<2x192xf32>
    %177 = math.exp %176 : vector<2x192xf32>
    %cst_66 = arith.constant 1.000000e+00 : f32
    %178 = vector.broadcast %cst_66 : f32 to vector<2x192xf32>
    %179 = arith.addf %178, %177 : vector<2x192xf32>
    %180 = arith.divf %178, %179 : vector<2x192xf32>
    %181 = vector.extract_strided_slice %180 {offsets = [0, 0], sizes = [2, 64], strides = [1, 1]} : vector<2x192xf32> to vector<2x64xf32>
    %182 = vector.extract_strided_slice %180 {offsets = [0, 64], sizes = [2, 64], strides = [1, 1]} : vector<2x192xf32> to vector<2x64xf32>
    %183 = vector.extract_strided_slice %180 {offsets = [0, 128], sizes = [2, 64], strides = [1, 1]} : vector<2x192xf32> to vector<2x64xf32>
    %184 = vector.extract_strided_slice %174 {offsets = [0, 192], sizes = [2, 64], strides = [1, 1]} : vector<2x256xf32> to vector<2x64xf32>
    %185 = math.tanh %184 : vector<2x64xf32>
    %186 = arith.mulf %182, %160 : vector<2x64xf32>
    %187 = arith.mulf %181, %185 : vector<2x64xf32>
    %188 = arith.addf %186, %187 : vector<2x64xf32>
    %189 = math.tanh %188 : vector<2x64xf32>
    %190 = arith.mulf %183, %189 : vector<2x64xf32>
    %191 = vector.extract_strided_slice %190 {offsets = [0, 0], sizes = [2, 32], strides = [1, 1]} : vector<2x64xf32> to vector<2x32xf32>
    %c6_67 = arith.constant 6 : index
    %c0_68 = arith.constant 0 : index
    %c0_69 = arith.constant 0 : index
    %192 = vector.load %arg4[%c6_67, %c0_68, %c0_69] : memref<8x2x64xf32, #tpu.memory_space<vmem>>, vector<1x2x32xf32>
    %193 = vector.shape_cast %192 : vector<1x2x32xf32> to vector<2x32xf32>
    %194 = vector.shape_cast %191 : vector<2x32xf32> to vector<1x2x32xf32>
    tpu.vector_store %arg4[%c6_67, %c0_68, %c0_69], %194 {strides = array<i32>} : memref<8x2x64xf32, #tpu.memory_space<vmem>>, vector<1x2x32xf32>,
    %195 = vector.extract_strided_slice %190 {offsets = [0, 32], sizes = [2, 32], strides = [1, 1]} : vector<2x64xf32> to vector<2x32xf32>
    %c1_70 = arith.constant 1 : index
    %c0_71 = arith.constant 0 : index
    %c32_72 = arith.constant 32 : index
    %196 = vector.load %arg4[%c1_70, %c0_71, %c32_72] : memref<8x2x64xf32, #tpu.memory_space<vmem>>, vector<1x2x32xf32>
    %197 = vector.shape_cast %196 : vector<1x2x32xf32> to vector<2x32xf32>
    %198 = vector.shape_cast %195 : vector<2x32xf32> to vector<1x2x32xf32>
    tpu.vector_store %arg4[%c1_70, %c0_71, %c32_72], %198 {strides = array<i32>} : memref<8x2x64xf32, #tpu.memory_space<vmem>>, vector<1x2x32xf32>,
    %c7_73 = arith.constant 7 : index
    %c0_74 = arith.constant 0 : index
    %c0_75 = arith.constant 0 : index
    %199 = vector.load %arg0[%c7_73, %c0_74, %c0_75] : memref<8x2x256xf32, #tpu.memory_space<vmem>>, vector<1x2x256xf32>
    %200 = vector.shape_cast %199 : vector<1x2x256xf32> to vector<2x256xf32>
    %cst_76 = arith.constant dense<0.000000e+00> : vector<2x256xf32>
    %201 = tpu.matmul %190, %0, %cst_76 {dimension_numbers = #tpu.dot_dimension_numbers<[1], [0], [0], [1], [0, 0, 1, 1], [], []>} : vector<2x64xf32>, vector<64x256xf32>, vector<2x256xf32> -> vector<2x256xf32>
    %202 = arith.addf %200, %201 : vector<2x256xf32>
    %203 = vector.extract_strided_slice %202 {offsets = [0, 0], sizes = [2, 192], strides = [1, 1]} : vector<2x256xf32> to vector<2x192xf32>
    %204 = arith.negf %203 : vector<2x192xf32>
    %205 = math.exp %204 : vector<2x192xf32>
    %cst_77 = arith.constant 1.000000e+00 : f32
    %206 = vector.broadcast %cst_77 : f32 to vector<2x192xf32>
    %207 = arith.addf %206, %205 : vector<2x192xf32>
    %208 = arith.divf %206, %207 : vector<2x192xf32>
    %209 = vector.extract_strided_slice %208 {offsets = [0, 0], sizes = [2, 64], strides = [1, 1]} : vector<2x192xf32> to vector<2x64xf32>
    %210 = vector.extract_strided_slice %208 {offsets = [0, 64], sizes = [2, 64], strides = [1, 1]} : vector<2x192xf32> to vector<2x64xf32>
    %211 = vector.extract_strided_slice %208 {offsets = [0, 128], sizes = [2, 64], strides = [1, 1]} : vector<2x192xf32> to vector<2x64xf32>
    %212 = vector.extract_strided_slice %202 {offsets = [0, 192], sizes = [2, 64], strides = [1, 1]} : vector<2x256xf32> to vector<2x64xf32>
    %213 = math.tanh %212 : vector<2x64xf32>
    %214 = arith.mulf %210, %188 : vector<2x64xf32>
    %215 = arith.mulf %209, %213 : vector<2x64xf32>
    %216 = arith.addf %214, %215 : vector<2x64xf32>
    %217 = math.tanh %216 : vector<2x64xf32>
    %218 = arith.mulf %211, %217 : vector<2x64xf32>
    %219 = vector.extract_strided_slice %218 {offsets = [0, 0], sizes = [2, 32], strides = [1, 1]} : vector<2x64xf32> to vector<2x32xf32>
    %c7_78 = arith.constant 7 : index
    %c0_79 = arith.constant 0 : index
    %c0_80 = arith.constant 0 : index
    %220 = vector.load %arg4[%c7_78, %c0_79, %c0_80] : memref<8x2x64xf32, #tpu.memory_space<vmem>>, vector<1x2x32xf32>
    %221 = vector.shape_cast %220 : vector<1x2x32xf32> to vector<2x32xf32>
    %222 = vector.shape_cast %219 : vector<2x32xf32> to vector<1x2x32xf32>
    tpu.vector_store %arg4[%c7_78, %c0_79, %c0_80], %222 {strides = array<i32>} : memref<8x2x64xf32, #tpu.memory_space<vmem>>, vector<1x2x32xf32>,
    %223 = vector.extract_strided_slice %218 {offsets = [0, 32], sizes = [2, 32], strides = [1, 1]} : vector<2x64xf32> to vector<2x32xf32>
    %c0_81 = arith.constant 0 : index
    %c0_82 = arith.constant 0 : index
    %c32_83 = arith.constant 32 : index
    %224 = vector.load %arg4[%c0_81, %c0_82, %c32_83] : memref<8x2x64xf32, #tpu.memory_space<vmem>>, vector<1x2x32xf32>
    %225 = vector.shape_cast %224 : vector<1x2x32xf32> to vector<2x32xf32>
    %226 = vector.shape_cast %223 : vector<2x32xf32> to vector<1x2x32xf32>
    tpu.vector_store %arg4[%c0_81, %c0_82, %c32_83], %226 {strides = array<i32>} : memref<8x2x64xf32, #tpu.memory_space<vmem>>, vector<1x2x32xf32>,
    %c0_84 = arith.constant 0 : index
    %c0_85 = arith.constant 0 : index
    %227 = vector.load %arg5[%c0_84, %c0_85] : memref<2x64xf32, #tpu.memory_space<vmem>>, vector<2x64xf32>
    tpu.vector_store %arg5[%c0_84, %c0_85], %218 {strides = array<i32>} : memref<2x64xf32, #tpu.memory_space<vmem>>, vector<2x64xf32>,
    %c0_86 = arith.constant 0 : index
    %c0_87 = arith.constant 0 : index
    %228 = vector.load %arg6[%c0_86, %c0_87] : memref<2x64xf32, #tpu.memory_space<vmem>>, vector<2x64xf32>
    tpu.vector_store %arg6[%c0_86, %c0_87], %216 {strides = array<i32>} : memref<2x64xf32, #tpu.memory_space<vmem>>, vector<2x64xf32>,
    return
  }
}

</mosaic_0001>

<bundles_post_ra>
// kernel: encoder_forward.2
= control target key start
LH: loop header
LB: loop body
LE: loop exit
PB: predicated region body
PF: predicated region fallthrough
CT: control target
= control target key end

     0   :  { %vm39_vm0 = vcmask 523264   ;;  %vm86_vm1 = vcmask 1041408   ;;  %s935_s7 = smov 64   ;;  %vm135_vm6 = vcmask 254976   ;;  %vm138_vm7 = vcmask 517376   ;;  %s1329_s1 = inlined_call_operand.vmem [shape: f32[64,256], index: 1, kind: input, shape index: {}]   ;;  %s1330_s2 = inlined_call_operand.vmem [shape: f32[2,64], index: 2, kind: input, shape index: {}]   ;;  %s1331_s0 = inlined_call_operand.vmem [shape: f32[8,2,256], index: 0, kind: input, shape index: {}]   ;;  %s1332_s3 = inlined_call_operand.vmem [shape: f32[2,64], index: 3, kind: input, shape index: {}]   ;;  %s1333_s4 = inlined_call_operand.vmem [shape: f32[8,2,64], index: 4, kind: output, shape index: {0}]   ;;  %s1334_s6 = inlined_call_operand.vmem [shape: f32[2,64], index: 6, kind: output, shape index: {2}]   ;;  %s1335_s5 = inlined_call_operand.vmem [shape: f32[2,64], index: 5, kind: output, shape index: {1}]  }
   0x1   :  { %v974_v0 = vld [vmem:[%s1329_s1 + $0x78] sm:$0xff]  ;;  %v979_v1 = vld [vmem:[%s1329_s1 + $0x70] sm:$0xff]  ;;  %v984_v2 = vld [vmem:[%s1329_s1 + $0x68] sm:$0xff] }
   0x2   :  { %71 = vmatpush.msra.mxu1 %v974_v0  ;;  %51 = vmatpush.msra.mxu0 %v979_v1  ;;  %v991_v3 = vld [vmem:[%s1329_s1 + $0x60] sm:$0xff]  ;;  %v996_v4 = vld [vmem:[%s1329_s1 + $0x58] sm:$0xff]  ;;  %v1001_v5 = vld [vmem:[%s1329_s1 + $0x50] sm:$0xff] }
   0x3   :  { %153 = vmatpush.msra.mxu2 %v979_v1  ;;  %173 = vmatpush.msra.mxu3 %v974_v0  ;;  %v1010_v6 = vld [vmem:[%s1329_s1 + $0x48] sm:$0xff]  ;;  %v1015_v7 = vld [vmem:[%s1329_s1 + $0x40] sm:$0xff]  ;;  %v1024_v8 = vld [vmem:[%s1329_s1 + $0x38] sm:$0xff] }
   0x4   :  { %72 = vmatpush.msra.mxu1 %v984_v2  ;;  %52 = vmatpush.msra.mxu0 %v991_v3  ;;  %v1029_v9 = vld [vmem:[%s1329_s1 + $0x30] sm:$0xff]  ;;  %v1038_v10 = vld [vmem:[%s1329_s1 + $0x28] sm:$0xff]  ;;  %v1043_v11 = vld [vmem:[%s1329_s1 + $0x20] sm:$0xff] }
   0x5   :  { %154 = vmatpush.msra.mxu2 %v991_v3  ;;  %174 = vmatpush.msra.mxu3 %v984_v2  ;;  %v1052_v12 = vld [vmem:[%s1329_s1 + $0x18] sm:$0xff]  ;;  %v1057_v13 = vld [vmem:[%s1329_s1 + $0x10] sm:$0xff]  ;;  %v1066_v14 = vld [vmem:[%s1329_s1 + $0x8] sm:$0xff] }
   0x6   :  { %73 = vmatpush.msra.mxu1 %v996_v4  ;;  %53 = vmatpush.msra.mxu0 %v1001_v5  ;;  %v1071_v15 = vld [vmem:[%s1329_s1] sm:$0xff] }
   0x7   :  { %155 = vmatpush.msra.mxu2 %v1001_v5  ;;  %175 = vmatpush.msra.mxu3 %v996_v4  ;;  %v36_v16 = vld [vmem:[%s1330_s2] sm:$0x3]  ;;  %v829_v51 = vld [vmem:[%s1331_s0 + $0x4] sm:$0xf] }
   0x8   :  { %74 = vmatpush.msra.mxu1 %v1010_v6  ;;  %54 = vmatpush.msra.mxu0 %v1015_v7  ;;  %v38_v20 = vld [vmem:[%s1331_s0] sm:$0xf] }
   0x9   :  { %156 = vmatpush.msra.mxu2 %v1015_v7  ;;  %176 = vmatpush.msra.mxu3 %v1010_v6  ;;  %v37_v23 = vld [vmem:[%s1332_s3] sm:$0x3] }
   0xa   :  { %75 = vmatpush.msra.mxu1 %v1024_v8  ;;  %55 = vmatpush.msra.mxu0 %v1029_v9 }
   0xb   :  { %157 = vmatpush.msra.mxu2 %v1029_v9  ;;  %177 = vmatpush.msra.mxu3 %v1024_v8 }
   0xc   :  { %76 = vmatpush.msra.mxu1 %v1038_v10  ;;  %56 = vmatpush.msra.mxu0 %v1043_v11 }
   0xd   :  { %158 = vmatpush.msra.mxu2 %v1043_v11  ;;  %178 = vmatpush.msra.mxu3 %v1038_v10 }
   0xe   :  { %77 = vmatpush.msra.mxu1 %v1052_v12  ;;  %57 = vmatpush.msra.mxu0 %v1057_v13 }
   0xf   :  { %159 = vmatpush.msra.mxu2 %v1057_v13  ;;  %179 = vmatpush.msra.mxu3 %v1052_v12 }
  0x10   :  { %78 = vmatpush.msra.mxu1 %v1066_v14  ;;  %58 = vmatpush.msra.mxu0 %v1071_v15 }
  0x11   :  { %826 = vmatmul.msk.f32.vlgmr.msra.gmra.mxu1 %vm39_vm0, %v36_v16  ;;  %825 = vmatmul.msk.f32.vlgmr.msra.gmra.mxu0 %vm39_vm0, %v36_v16 }
  0x12   :  { %160 = vmatpush.msra.mxu2 %v1071_v15  ;;  %180 = vmatpush.msra.mxu3 %v1066_v14 }
  0x13   :  { %249 = vmatpush.msrb.mxu0 %v979_v1  ;;  %269 = vmatpush.msrb.mxu1 %v974_v0 }
  0x14   :  { %345 = vmatpush.msrb.mxu2 %v979_v1  ;;  %365 = vmatpush.msrb.mxu3 %v974_v0 }
  0x15   :  { %250 = vmatpush.msrb.mxu0 %v991_v3  ;;  %270 = vmatpush.msrb.mxu1 %v984_v2 }
  0x16   :  { %346 = vmatpush.msrb.mxu2 %v991_v3  ;;  %366 = vmatpush.msrb.mxu3 %v984_v2 }
  0x17   :  { %251 = vmatpush.msrb.mxu0 %v1001_v5  ;;  %271 = vmatpush.msrb.mxu1 %v996_v4 }
  0x18   :  { %347 = vmatpush.msrb.mxu2 %v1001_v5  ;;  %367 = vmatpush.msrb.mxu3 %v996_v4 }
  0x19   :  { %252 = vmatpush.msrb.mxu0 %v1015_v7  ;;  %272 = vmatpush.msrb.mxu1 %v1010_v6 }
  0x1a   :  { %348 = vmatpush.msrb.mxu2 %v1015_v7  ;;  %368 = vmatpush.msrb.mxu3 %v1010_v6 }
  0x1b   :  { %253 = vmatpush.msrb.mxu0 %v1029_v9  ;;  %273 = vmatpush.msrb.mxu1 %v1024_v8 }
  0x1c   :  { %349 = vmatpush.msrb.mxu2 %v1029_v9  ;;  %369 = vmatpush.msrb.mxu3 %v1024_v8 }
  0x1d   :  { %254 = vmatpush.msrb.mxu0 %v1043_v11  ;;  %274 = vmatpush.msrb.mxu1 %v1038_v10 }
  0x1e   :  { %350 = vmatpush.msrb.mxu2 %v1043_v11  ;;  %370 = vmatpush.msrb.mxu3 %v1038_v10 }
  0x1f   :  { %255 = vmatpush.msrb.mxu0 %v1057_v13  ;;  %275 = vmatpush.msrb.mxu1 %v1052_v12 }
  0x20   :  { %351 = vmatpush.msrb.mxu2 %v1057_v13  ;;  %371 = vmatpush.msrb.mxu3 %v1052_v12 }
  0x21   :  { %256 = vmatpush.msrb.mxu0 %v1071_v15  ;;  %276 = vmatpush.msrb.mxu1 %v1066_v14 }
  0x22   :  { %352 = vmatpush.msrb.mxu2 %v1071_v15  ;;  %372 = vmatpush.msrb.mxu3 %v1066_v14 }
  0x23   :  { %441 = vmatpush.msra.mxu0 %v979_v1  ;;  %461 = vmatpush.msra.mxu1 %v974_v0 }
  0x25   :  { %442 = vmatpush.msra.mxu0 %v991_v3  ;;  %462 = vmatpush.msra.mxu1 %v984_v2 }
  0x27   :  { %443 = vmatpush.msra.mxu0 %v1001_v5  ;;  %463 = vmatpush.msra.mxu1 %v996_v4 }
  0x29   :  { %444 = vmatpush.msra.mxu0 %v1015_v7  ;;  %464 = vmatpush.msra.mxu1 %v1010_v6 }
  0x2b   :  { %445 = vmatpush.msra.mxu0 %v1029_v9  ;;  %465 = vmatpush.msra.mxu1 %v1024_v8 }
  0x2d   :  { %446 = vmatpush.msra.mxu0 %v1043_v11  ;;  %466 = vmatpush.msra.mxu1 %v1038_v10 }
  0x2f   :  { %447 = vmatpush.msra.mxu0 %v1057_v13  ;;  %467 = vmatpush.msra.mxu1 %v1052_v12 }
  0x31   :  { %448 = vmatpush.msra.mxu0 %v1071_v15  ;;  %468 = vmatpush.msra.mxu1 %v1066_v14 }
  0x8e   :  { %v80_v17 = vpop.f32.mrf.mxu1  ;;  %v60_v18 = vpop.f32.mrf.mxu0 }
  0x8f   :  { %v85_v19 = vrot.slane %v80_v17, 6 }
  0x91   :  { %v87_v21 = vsel %vm86_vm1, %v60_v18, %v85_v19 }
  0x92   :  { %v89_v22 = vadd.f32 %v87_v21, %v38_v20 }
  0x94   :  { %110 = vrot.lane.b32.xlu0 %v89_v22, %s935_s7  ;;  %v827_v24 = vmul.f32 -1.442695, %v89_v22 }
  0x96   :  { %871 = vpow2.f32 %v827_v24 }
  0x9c   :  { %116 = vrot.lane.b32.xlu0 %v37_v23, %s935_s7  ;;  %v872_v25 = vpop.eup %871 }
  0x9d   :  { %v93_v26 = vadd.f32 1.0, %v872_v25 }
  0x9f   :  { %873 = vrcp.f32 %v93_v26  ;;  %v105_v34 = vand.u32 2147483648, %v93_v26  ;;  %vm99_vm3 = vweird.f32 %v93_v26  ;;  %v103_v35 = vand.u32 2147483647, %v93_v26 }
  0xa1   :  { %v106_v37 = vor.u32 1.1754944e-38, %v105_v34  ;;  %vm104_vm5 = vcmp.eq.f32.partialorder %v103_v35, 8.507059e+37 }
  0xa5   :  { %v874_v27 = vpop.eup %873 }
  0xa6   :  { %v95_v28 = vmul.f32 %v874_v27, %v93_v26  ;;  %vm100_vm2 = vweird.f32 %v874_v27 }
  0xa7   :  { %vm101_vm4 = vmor %vm99_vm3, %vm100_vm2 }
  0xa8   :  { %v96_v29 = vsub.f32 1.0, %v95_v28 }
  0xaa   :  { %v97_v30 = vmul.f32 %v874_v27, %v96_v29 }
  0xac   :  { %v98_v33 = vadd.f32 %v874_v27, %v97_v30 }
  0xae   :  { %v102_v36 = vsel %vm101_vm4, %v874_v27, %v98_v33  ;;  %v835_v33 = vld [vmem:[%s1331_s0 + $0x8] sm:$0xf] }
  0xaf   :  { %v107_v39 = vsel %vm104_vm5, %v106_v37, %v102_v36 }
  0xb0   :  { %v128_v46 = vrot.slane %v107_v39, 2 }
 0x106   :  { %v111_v31 = vpop.permute.xlu0 %110 }
 0x107   :  { %v112_v32 = vrot.slane %v111_v31, 2 }
 0x109   :  { %875 = vtanh.f32 %v112_v32 }
 0x10e   :  { %v117_v41 = vpop.permute.xlu0 %116 }
 0x10f   :  { %v876_v38 = vpop.eup %875  ;;  %v119_v42 = vmul.f32 %v117_v41, %v107_v39 }
 0x110   :  { %v120_v40 = vmul.f32 %v876_v38, %v107_v39 }
 0x112   :  { %122 = vrot.lane.b32.xlu1 %v120_v40, %s935_s7 }
 0x184   :  { %v123_v43 = vpop.permute.xlu1 %122 }
 0x185   :  { %v125_v44 = vadd.f32 %v123_v43, %v119_v42 }
 0x187   :  { %877 = vtanh.f32 %v125_v44 }
 0x18d   :  { %v878_v45 = vpop.eup %877 }
 0x18e   :  { %131 = vrot.lane.b32.xlu1 %v878_v45, %s935_s7 }
 0x200   :  { %v132_v47 = vpop.permute.xlu1 %131 }
 0x201   :  { %v134_v48 = vmul.f32 %v132_v47, %v128_v46 }
 0x203   :  { %136 = vst.msk [vmem:[%s1333_s4] sm:$0x3] %vm135_vm6, %v134_v48  ;;  %830 = vmatmul.msk.f32.vlgmr.msra.gmra.mxu2 %vm39_vm0, %v134_v48  ;;  %831 = vmatmul.msk.f32.vlgmr.msra.gmra.mxu3 %vm39_vm0, %v134_v48 }
 0x204   :  { %828 = vst.msk [vmem:[%s1333_s4 + $0xe] sm:$0x3] %vm138_vm7, %v134_v48  ;;  %535 = vmatpush.msra.mxu2 %v979_v1  ;;  %555 = vmatpush.msra.mxu3 %v974_v0 }
 0x206   :  { %536 = vmatpush.msra.mxu2 %v991_v3  ;;  %556 = vmatpush.msra.mxu3 %v984_v2 }
 0x208   :  { %537 = vmatpush.msra.mxu2 %v1001_v5  ;;  %557 = vmatpush.msra.mxu3 %v996_v4 }
 0x20a   :  { %538 = vmatpush.msra.mxu2 %v1015_v7  ;;  %558 = vmatpush.msra.mxu3 %v1010_v6 }
 0x20c   :  { %539 = vmatpush.msra.mxu2 %v1029_v9  ;;  %559 = vmatpush.msra.mxu3 %v1024_v8 }
 0x20e   :  { %540 = vmatpush.msra.mxu2 %v1043_v11  ;;  %560 = vmatpush.msra.mxu3 %v1038_v10 }
 0x210   :  { %541 = vmatpush.msra.mxu2 %v1057_v13  ;;  %561 = vmatpush.msra.mxu3 %v1052_v12 }
 0x212   :  { %542 = vmatpush.msra.mxu2 %v1071_v15  ;;  %562 = vmatpush.msra.mxu3 %v1066_v14 }
 0x286   :  { %v182_v49 = vpop.f32.mrf.mxu3  ;;  %v162_v52 = vpop.f32.mrf.mxu2 }
 0x287   :  { %v187_v50 = vrot.slane %v182_v49, 6 }
 0x289   :  { %v188_v53 = vsel %vm86_vm1, %v162_v52, %v187_v50 }
 0x28a   :  { %v190_v54 = vadd.f32 %v829_v51, %v188_v53 }
 0x28c   :  { %211 = vrot.lane.b32.xlu2 %v190_v54, %s935_s7  ;;  %v832_v55 = vmul.f32 -1.442695, %v190_v54 }
 0x28e   :  { %879 = vpow2.f32 %v832_v55 }
 0x294   :  { %v880_v56 = vpop.eup %879 }
 0x295   :  { %v194_v57 = vadd.f32 1.0, %v880_v56 }
 0x297   :  { %881 = vrcp.f32 %v194_v57  ;;  %v206_v17 = vand.u32 2147483648, %v194_v57  ;;  %vm200_vm9 = vweird.f32 %v194_v57  ;;  %v204_v18 = vand.u32 2147483647, %v194_v57 }
 0x299   :  { %v207_v20 = vor.u32 1.1754944e-38, %v206_v17  ;;  %vm205_vm11 = vcmp.eq.f32.partialorder %v204_v18, 8.507059e+37 }
 0x29d   :  { %v882_v58 = vpop.eup %881 }
 0x29e   :  { %v196_v59 = vmul.f32 %v882_v58, %v194_v57  ;;  %vm201_vm8 = vweird.f32 %v882_v58 }
 0x29f   :  { %vm202_vm10 = vmor %vm200_vm9, %vm201_vm8 }
 0x2a0   :  { %v197_v60 = vsub.f32 1.0, %v196_v59 }
 0x2a2   :  { %v198_v61 = vmul.f32 %v882_v58, %v197_v60 }
 0x2a4   :  { %v199_v16 = vadd.f32 %v882_v58, %v198_v61 }
 0x2a6   :  { %v203_v19 = vsel %vm202_vm10, %v882_v58, %v199_v16 }
 0x2a7   :  { %v208_v22 = vsel %vm205_vm11, %v207_v20, %v203_v19 }
 0x2a8   :  { %v216_v24 = vmul.f32 %v208_v22, %v125_v44  ;;  %v225_v28 = vrot.slane %v208_v22, 2 }
 0x2e6   :  { %v212_v62 = vpop.permute.xlu2 %211 }
 0x2e7   :  { %v213_v63 = vrot.slane %v212_v62, 2 }
 0x2e9   :  { %883 = vtanh.f32 %v213_v63 }
 0x2ef   :  { %v884_v21 = vpop.eup %883 }
 0x2f0   :  { %v217_v23 = vmul.f32 %v884_v21, %v208_v22 }
 0x2f2   :  { %219 = vrot.lane.b32.xlu2 %v217_v23, %s935_s7 }
 0x34c   :  { %v220_v25 = vpop.permute.xlu2 %219 }
 0x34d   :  { %v222_v26 = vadd.f32 %v220_v25, %v216_v24 }
 0x34f   :  { %885 = vtanh.f32 %v222_v26 }
 0x355   :  { %v886_v27 = vpop.eup %885 }
 0x356   :  { %228 = vrot.lane.b32.xlu0 %v886_v27, %s935_s7 }
 0x3c8   :  { %v229_v29 = vpop.permute.xlu0 %228 }
 0x3c9   :  { %v231_v30 = vmul.f32 %v229_v29, %v225_v28  ;;  %v847_v29 = vld [vmem:[%s1331_s0 + $0x10] sm:$0xf] }
 0x3cb   :  { %833 = vst.msk [vmem:[%s1333_s4 + $0x2] sm:$0x3] %vm135_vm6, %v231_v30  ;;  %836 = vmatmul.msk.f32.vlgmr.msrb.gmra.mxu0 %vm39_vm0, %v231_v30  ;;  %837 = vmatmul.msk.f32.vlgmr.msrb.gmra.mxu1 %vm39_vm0, %v231_v30 }
 0x3cc   :  { %834 = vst.msk [vmem:[%s1333_s4 + $0xc] sm:$0x3] %vm138_vm7, %v231_v30  ;;  %629 = vmatpush.msrb.mxu0 %v979_v1  ;;  %649 = vmatpush.msrb.mxu1 %v974_v0 }
 0x3ce   :  { %630 = vmatpush.msrb.mxu0 %v991_v3  ;;  %650 = vmatpush.msrb.mxu1 %v984_v2 }
 0x3d0   :  { %631 = vmatpush.msrb.mxu0 %v1001_v5  ;;  %651 = vmatpush.msrb.mxu1 %v996_v4 }
 0x3d2   :  { %632 = vmatpush.msrb.mxu0 %v1015_v7  ;;  %652 = vmatpush.msrb.mxu1 %v1010_v6 }
 0x3d4   :  { %633 = vmatpush.msrb.mxu0 %v1029_v9  ;;  %653 = vmatpush.msrb.mxu1 %v1024_v8 }
 0x3d6   :  { %634 = vmatpush.msrb.mxu0 %v1043_v11  ;;  %654 = vmatpush.msrb.mxu1 %v1038_v10 }
 0x3d8   :  { %635 = vmatpush.msrb.mxu0 %v1057_v13  ;;  %655 = vmatpush.msrb.mxu1 %v1052_v12 }
 0x3da   :  { %636 = vmatpush.msrb.mxu0 %v1071_v15  ;;  %656 = vmatpush.msrb.mxu1 %v1066_v14 }
 0x448   :  { %v278_v31 = vpop.f32.mrf.mxu1  ;;  %v258_v34 = vpop.f32.mrf.mxu0 }
 0x449   :  { %v283_v32 = vrot.slane %v278_v31, 6 }
 0x44b   :  { %v284_v35 = vsel %vm86_vm1, %v258_v34, %v283_v32 }
 0x44c   :  { %v286_v36 = vadd.f32 %v835_v33, %v284_v35 }
 0x44e   :  { %307 = vrot.lane.b32.xlu1 %v286_v36, %s935_s7  ;;  %v838_v37 = vmul.f32 -1.442695, %v286_v36 }
 0x450   :  { %887 = vpow2.f32 %v838_v37 }
 0x456   :  { %v888_v38 = vpop.eup %887 }
 0x457   :  { %v290_v39 = vadd.f32 1.0, %v888_v38 }
 0x459   :  { %889 = vrcp.f32 %v290_v39  ;;  %v302_v47 = vand.u32 2147483648, %v290_v39  ;;  %vm296_vm13 = vweird.f32 %v290_v39  ;;  %v300_v48 = vand.u32 2147483647, %v290_v39 }
 0x45b   :  { %v303_v50 = vor.u32 1.1754944e-38, %v302_v47  ;;  %vm301_vm15 = vcmp.eq.f32.partialorder %v300_v48, 8.507059e+37 }
 0x45f   :  { %v890_v40 = vpop.eup %889 }
 0x460   :  { %v292_v41 = vmul.f32 %v890_v40, %v290_v39  ;;  %vm297_vm12 = vweird.f32 %v890_v40 }
 0x461   :  { %vm298_vm14 = vmor %vm296_vm13, %vm297_vm12 }
 0x462   :  { %v293_v42 = vsub.f32 1.0, %v292_v41 }
 0x464   :  { %v294_v43 = vmul.f32 %v890_v40, %v293_v42 }
 0x466   :  { %v295_v46 = vadd.f32 %v890_v40, %v294_v43 }
 0x468   :  { %v299_v49 = vsel %vm298_vm14, %v890_v40, %v295_v46 }
 0x469   :  { %v304_v52 = vsel %vm301_vm15, %v303_v50, %v299_v49 }
 0x46a   :  { %v312_v54 = vmul.f32 %v304_v52, %v222_v26  ;;  %v321_v58 = vrot.slane %v304_v52, 2 }
 0x4c0   :  { %v308_v44 = vpop.permute.xlu1 %307 }
 0x4c1   :  { %v309_v45 = vrot.slane %v308_v44, 2 }
 0x4c3   :  { %891 = vtanh.f32 %v309_v45 }
 0x4c9   :  { %v892_v51 = vpop.eup %891 }
 0x4ca   :  { %v313_v53 = vmul.f32 %v892_v51, %v304_v52 }
 0x4cc   :  { %315 = vrot.lane.b32.xlu2 %v313_v53, %s935_s7 }
 0x526   :  { %v316_v55 = vpop.permute.xlu2 %315 }
 0x527   :  { %v318_v56 = vadd.f32 %v316_v55, %v312_v54 }
 0x529   :  { %893 = vtanh.f32 %v318_v56 }
 0x52f   :  { %v894_v57 = vpop.eup %893 }
 0x530   :  { %324 = vrot.lane.b32.xlu0 %v894_v57, %s935_s7 }
 0x5a2   :  { %v325_v59 = vpop.permute.xlu0 %324 }
 0x5a3   :  { %v327_v60 = vmul.f32 %v325_v59, %v321_v58  ;;  %v853_v59 = vld [vmem:[%s1331_s0 + $0x14] sm:$0xf] }
 0x5a5   :  { %839 = vst.msk [vmem:[%s1333_s4 + $0x4] sm:$0x3] %vm135_vm6, %v327_v60  ;;  %842 = vmatmul.msk.f32.vlgmr.msrb.gmra.mxu2 %vm39_vm0, %v327_v60  ;;  %843 = vmatmul.msk.f32.vlgmr.msrb.gmra.mxu3 %vm39_vm0, %v327_v60 }
 0x5a6   :  { %840 = vst.msk [vmem:[%s1333_s4 + $0xa] sm:$0x3] %vm138_vm7, %v327_v60  ;;  %723 = vmatpush.msrb.mxu2 %v979_v1  ;;  %743 = vmatpush.msrb.mxu3 %v974_v0 }
 0x5a8   :  { %724 = vmatpush.msrb.mxu2 %v991_v3  ;;  %744 = vmatpush.msrb.mxu3 %v984_v2  ;;  %v841_v2 = vld [vmem:[%s1331_s0 + $0xc] sm:$0xf] }
 0x5aa   :  { %725 = vmatpush.msrb.mxu2 %v1001_v5  ;;  %745 = vmatpush.msrb.mxu3 %v996_v4 }
 0x5ac   :  { %726 = vmatpush.msrb.mxu2 %v1015_v7  ;;  %746 = vmatpush.msrb.mxu3 %v1010_v6 }
 0x5ae   :  { %727 = vmatpush.msrb.mxu2 %v1029_v9  ;;  %747 = vmatpush.msrb.mxu3 %v1024_v8 }
 0x5b0   :  { %728 = vmatpush.msrb.mxu2 %v1043_v11  ;;  %748 = vmatpush.msrb.mxu3 %v1038_v10 }
 0x5b2   :  { %729 = vmatpush.msrb.mxu2 %v1057_v13  ;;  %749 = vmatpush.msrb.mxu3 %v1052_v12 }
 0x5b4   :  { %730 = vmatpush.msrb.mxu2 %v1071_v15  ;;  %750 = vmatpush.msrb.mxu3 %v1066_v14 }
 0x628   :  { %v374_v0 = vpop.f32.mrf.mxu3  ;;  %v354_v3 = vpop.f32.mrf.mxu2 }
 0x629   :  { %v379_v1 = vrot.slane %v374_v0, 6 }
 0x62b   :  { %v380_v4 = vsel %vm86_vm1, %v354_v3, %v379_v1 }
 0x62c   :  { %v382_v5 = vadd.f32 %v841_v2, %v380_v4 }
 0x62e   :  { %403 = vrot.lane.b32.xlu1 %v382_v5, %s935_s7  ;;  %v844_v6 = vmul.f32 -1.442695, %v382_v5 }
 0x630   :  { %895 = vpow2.f32 %v844_v6 }
 0x636   :  { %v896_v7 = vpop.eup %895 }
 0x637   :  { %v386_v8 = vadd.f32 1.0, %v896_v7 }
 0x639   :  { %897 = vrcp.f32 %v386_v8  ;;  %v398_v61 = vand.u32 2147483648, %v386_v8  ;;  %vm392_vm3 = vweird.f32 %v386_v8  ;;  %v396_v62 = vand.u32 2147483647, %v386_v8 }
 0x63b   :  { %v399_v16 = vor.u32 1.1754944e-38, %v398_v61  ;;  %vm397_vm5 = vcmp.eq.f32.partialorder %v396_v62, 8.507059e+37 }
 0x63f   :  { %v898_v9 = vpop.eup %897 }
 0x640   :  { %v388_v10 = vmul.f32 %v898_v9, %v386_v8  ;;  %vm393_vm2 = vweird.f32 %v898_v9 }
 0x641   :  { %vm394_vm4 = vmor %vm392_vm3, %vm393_vm2 }
 0x642   :  { %v389_v11 = vsub.f32 1.0, %v388_v10 }
 0x644   :  { %v390_v12 = vmul.f32 %v898_v9, %v389_v11 }
 0x646   :  { %v391_v15 = vadd.f32 %v898_v9, %v390_v12 }
 0x648   :  { %v395_v63 = vsel %vm394_vm4, %v898_v9, %v391_v15 }
 0x649   :  { %v400_v18 = vsel %vm397_vm5, %v399_v16, %v395_v63 }
 0x64a   :  { %v408_v20 = vmul.f32 %v400_v18, %v318_v56  ;;  %v417_v24 = vrot.slane %v400_v18, 2 }
 0x6a0   :  { %v404_v13 = vpop.permute.xlu1 %403 }
 0x6a1   :  { %v405_v14 = vrot.slane %v404_v13, 2 }
 0x6a3   :  { %899 = vtanh.f32 %v405_v14 }
 0x6a9   :  { %v900_v17 = vpop.eup %899 }
 0x6aa   :  { %v409_v19 = vmul.f32 %v900_v17, %v400_v18 }
 0x6ac   :  { %411 = vrot.lane.b32.xlu2 %v409_v19, %s935_s7 }
 0x706   :  { %v412_v21 = vpop.permute.xlu2 %411 }
 0x707   :  { %v414_v22 = vadd.f32 %v412_v21, %v408_v20 }
 0x709   :  { %901 = vtanh.f32 %v414_v22 }
 0x70f   :  { %v902_v23 = vpop.eup %901 }
 0x710   :  { %420 = vrot.lane.b32.xlu0 %v902_v23, %s935_s7 }
 0x782   :  { %v421_v25 = vpop.permute.xlu0 %420 }
 0x783   :  { %v423_v26 = vmul.f32 %v421_v25, %v417_v24  ;;  %v859_v25 = vld [vmem:[%s1331_s0 + $0x18] sm:$0xf] }
 0x785   :  { %845 = vst.msk [vmem:[%s1333_s4 + $0x6] sm:$0x3] %vm135_vm6, %v423_v26  ;;  %848 = vmatmul.msk.f32.vlgmr.msra.gmra.mxu0 %vm39_vm0, %v423_v26  ;;  %849 = vmatmul.msk.f32.vlgmr.msra.gmra.mxu1 %vm39_vm0, %v423_v26 }
 0x786   :  { %846 = vst.msk [vmem:[%s1333_s4 + $0x8] sm:$0x3] %vm138_vm7, %v423_v26 }
 0x802   :  { %v470_v27 = vpop.f32.mrf.mxu1  ;;  %v450_v30 = vpop.f32.mrf.mxu0 }
 0x803   :  { %v475_v28 = vrot.slane %v470_v27, 6 }
 0x805   :  { %v476_v31 = vsel %vm86_vm1, %v450_v30, %v475_v28 }
 0x806   :  { %v478_v32 = vadd.f32 %v847_v29, %v476_v31 }
 0x808   :  { %499 = vrot.lane.b32.xlu1 %v478_v32, %s935_s7  ;;  %v850_v33 = vmul.f32 -1.442695, %v478_v32 }
 0x80a   :  { %903 = vpow2.f32 %v850_v33 }
 0x810   :  { %v904_v34 = vpop.eup %903 }
 0x811   :  { %v482_v35 = vadd.f32 1.0, %v904_v34 }
 0x813   :  { %905 = vrcp.f32 %v482_v35  ;;  %v494_v43 = vand.u32 2147483648, %v482_v35  ;;  %vm488_vm9 = vweird.f32 %v482_v35  ;;  %v492_v44 = vand.u32 2147483647, %v482_v35 }
 0x815   :  { %v495_v46 = vor.u32 1.1754944e-38, %v494_v43  ;;  %vm493_vm11 = vcmp.eq.f32.partialorder %v492_v44, 8.507059e+37 }
 0x819   :  { %v906_v36 = vpop.eup %905 }
 0x81a   :  { %v484_v37 = vmul.f32 %v906_v36, %v482_v35  ;;  %vm489_vm8 = vweird.f32 %v906_v36 }
 0x81b   :  { %vm490_vm10 = vmor %vm488_vm9, %vm489_vm8 }
 0x81c   :  { %v485_v38 = vsub.f32 1.0, %v484_v37 }
 0x81e   :  { %v486_v39 = vmul.f32 %v906_v36, %v485_v38 }
 0x820   :  { %v487_v42 = vadd.f32 %v906_v36, %v486_v39 }
 0x822   :  { %v491_v45 = vsel %vm490_vm10, %v906_v36, %v487_v42  ;;  %vm804_vm10 = vcmask 517120  }
 0x823   :  { %v496_v48 = vsel %vm493_vm11, %v495_v46, %v491_v45 }
 0x824   :  { %v504_v50 = vmul.f32 %v496_v48, %v414_v22  ;;  %v513_v54 = vrot.slane %v496_v48, 2 }
 0x87a   :  { %v500_v40 = vpop.permute.xlu1 %499 }
 0x87b   :  { %v501_v41 = vrot.slane %v500_v40, 2 }
 0x87d   :  { %907 = vtanh.f32 %v501_v41 }
 0x883   :  { %v908_v47 = vpop.eup %907 }
 0x884   :  { %v505_v49 = vmul.f32 %v908_v47, %v496_v48 }
 0x886   :  { %507 = vrot.lane.b32.xlu2 %v505_v49, %s935_s7 }
 0x8e0   :  { %v508_v51 = vpop.permute.xlu2 %507 }
 0x8e1   :  { %v510_v52 = vadd.f32 %v508_v51, %v504_v50 }
 0x8e3   :  { %909 = vtanh.f32 %v510_v52 }
 0x8e9   :  { %v910_v53 = vpop.eup %909 }
 0x8ea   :  { %516 = vrot.lane.b32.xlu0 %v910_v53, %s935_s7 }
 0x95c   :  { %v517_v55 = vpop.permute.xlu0 %516 }
 0x95d   :  { %v519_v56 = vmul.f32 %v517_v55, %v513_v54  ;;  %v865_v55 = vld [vmem:[%s1331_s0 + $0x1c] sm:$0xf] }
 0x95f   :  { %851 = vst.msk [vmem:[%s1333_s4 + $0x8] sm:$0x3] %vm135_vm6, %v519_v56  ;;  %854 = vmatmul.msk.f32.vlgmr.msra.gmra.mxu2 %vm39_vm0, %v519_v56  ;;  %855 = vmatmul.msk.f32.vlgmr.msra.gmra.mxu3 %vm39_vm0, %v519_v56 }
 0x960   :  { %852 = vst.msk [vmem:[%s1333_s4 + $0x6] sm:$0x3] %vm138_vm7, %v519_v56 }
 0x9e2   :  { %v564_v57 = vpop.f32.mrf.mxu3  ;;  %v544_v60 = vpop.f32.mrf.mxu2 }
 0x9e3   :  { %v569_v58 = vrot.slane %v564_v57, 6 }
 0x9e5   :  { %v570_v0 = vsel %vm86_vm1, %v544_v60, %v569_v58 }
 0x9e6   :  { %v572_v1 = vadd.f32 %v853_v59, %v570_v0 }
 0x9e8   :  { %593 = vrot.lane.b32.xlu1 %v572_v1, %s935_s7  ;;  %v856_v2 = vmul.f32 -1.442695, %v572_v1 }
 0x9ea   :  { %911 = vpow2.f32 %v856_v2 }
 0x9f0   :  { %v912_v3 = vpop.eup %911 }
 0x9f1   :  { %v576_v4 = vadd.f32 1.0, %v912_v3 }
 0x9f3   :  { %913 = vrcp.f32 %v576_v4  ;;  %v588_v12 = vand.u32 2147483648, %v576_v4  ;;  %vm582_vm13 = vweird.f32 %v576_v4  ;;  %v586_v13 = vand.u32 2147483647, %v576_v4 }
 0x9f5   :  { %v589_v15 = vor.u32 1.1754944e-38, %v588_v12  ;;  %vm587_vm15 = vcmp.eq.f32.partialorder %v586_v13, 8.507059e+37 }
 0x9f9   :  { %v914_v5 = vpop.eup %913 }
 0x9fa   :  { %v578_v6 = vmul.f32 %v914_v5, %v576_v4  ;;  %vm583_vm12 = vweird.f32 %v914_v5 }
 0x9fb   :  { %vm584_vm14 = vmor %vm582_vm13, %vm583_vm12 }
 0x9fc   :  { %v579_v7 = vsub.f32 1.0, %v578_v6 }
 0x9fe   :  { %v580_v8 = vmul.f32 %v914_v5, %v579_v7 }
 0xa00   :  { %v581_v11 = vadd.f32 %v914_v5, %v580_v8 }
 0xa02   :  { %v585_v14 = vsel %vm584_vm14, %v914_v5, %v581_v11 }
 0xa03   :  { %v590_v62 = vsel %vm587_vm15, %v589_v15, %v585_v14 }
 0xa04   :  { %v598_v16 = vmul.f32 %v590_v62, %v510_v52  ;;  %v607_v20 = vrot.slane %v590_v62, 2 }
 0xa5a   :  { %v594_v9 = vpop.permute.xlu1 %593 }
 0xa5b   :  { %v595_v10 = vrot.slane %v594_v9, 2 }
 0xa5d   :  { %915 = vtanh.f32 %v595_v10 }
 0xa63   :  { %v916_v61 = vpop.eup %915 }
 0xa64   :  { %v599_v63 = vmul.f32 %v916_v61, %v590_v62 }
 0xa66   :  { %601 = vrot.lane.b32.xlu2 %v599_v63, %s935_s7 }
 0xac0   :  { %v602_v17 = vpop.permute.xlu2 %601 }
 0xac1   :  { %v604_v18 = vadd.f32 %v602_v17, %v598_v16 }
 0xac3   :  { %917 = vtanh.f32 %v604_v18 }
 0xac9   :  { %v918_v19 = vpop.eup %917 }
 0xaca   :  { %610 = vrot.lane.b32.xlu0 %v918_v19, %s935_s7 }
 0xb3c   :  { %v611_v21 = vpop.permute.xlu0 %610 }
 0xb3d   :  { %v613_v22 = vmul.f32 %v611_v21, %v607_v20 }
 0xb3f   :  { %857 = vst.msk [vmem:[%s1333_s4 + $0xa] sm:$0x3] %vm135_vm6, %v613_v22  ;;  %860 = vmatmul.msk.f32.vlgmr.msrb.gmra.mxu0 %vm39_vm0, %v613_v22  ;;  %861 = vmatmul.msk.f32.vlgmr.msrb.gmra.mxu1 %vm39_vm0, %v613_v22 }
 0xb40   :  { %858 = vst.msk [vmem:[%s1333_s4 + $0x4] sm:$0x3] %vm138_vm7, %v613_v22 }
 0xbbc   :  { %v658_v23 = vpop.f32.mrf.mxu1  ;;  %v638_v26 = vpop.f32.mrf.mxu0 }
 0xbbd   :  { %v663_v24 = vrot.slane %v658_v23, 6 }
 0xbbf   :  { %v664_v27 = vsel %vm86_vm1, %v638_v26, %v663_v24 }
 0xbc0   :  { %v666_v28 = vadd.f32 %v859_v25, %v664_v27 }
 0xbc2   :  { %687 = vrot.lane.b32.xlu1 %v666_v28, %s935_s7  ;;  %v862_v29 = vmul.f32 -1.442695, %v666_v28 }
 0xbc4   :  { %919 = vpow2.f32 %v862_v29 }
 0xbca   :  { %v920_v30 = vpop.eup %919 }
 0xbcb   :  { %v670_v31 = vadd.f32 1.0, %v920_v30 }
 0xbcd   :  { %921 = vrcp.f32 %v670_v31  ;;  %v682_v39 = vand.u32 2147483648, %v670_v31  ;;  %vm676_vm3 = vweird.f32 %v670_v31  ;;  %v680_v40 = vand.u32 2147483647, %v670_v31 }
 0xbcf   :  { %v683_v42 = vor.u32 1.1754944e-38, %v682_v39  ;;  %vm681_vm5 = vcmp.eq.f32.partialorder %v680_v40, 8.507059e+37 }
 0xbd3   :  { %v922_v32 = vpop.eup %921 }
 0xbd4   :  { %v672_v33 = vmul.f32 %v922_v32, %v670_v31  ;;  %vm677_vm2 = vweird.f32 %v922_v32 }
 0xbd5   :  { %vm678_vm4 = vmor %vm676_vm3, %vm677_vm2 }
 0xbd6   :  { %v673_v34 = vsub.f32 1.0, %v672_v33 }
 0xbd8   :  { %v674_v35 = vmul.f32 %v922_v32, %v673_v34 }
 0xbda   :  { %v675_v38 = vadd.f32 %v922_v32, %v674_v35 }
 0xbdc   :  { %v679_v41 = vsel %vm678_vm4, %v922_v32, %v675_v38 }
 0xbdd   :  { %v684_v44 = vsel %vm681_vm5, %v683_v42, %v679_v41 }
 0xbde   :  { %v692_v46 = vmul.f32 %v684_v44, %v604_v18  ;;  %v701_v50 = vrot.slane %v684_v44, 2 }
 0xc34   :  { %v688_v36 = vpop.permute.xlu1 %687 }
 0xc35   :  { %v689_v37 = vrot.slane %v688_v36, 2 }
 0xc37   :  { %923 = vtanh.f32 %v689_v37 }
 0xc3d   :  { %v924_v43 = vpop.eup %923 }
 0xc3e   :  { %v693_v45 = vmul.f32 %v924_v43, %v684_v44 }
 0xc40   :  { %695 = vrot.lane.b32.xlu2 %v693_v45, %s935_s7 }
 0xc9a   :  { %v696_v47 = vpop.permute.xlu2 %695 }
 0xc9b   :  { %v698_v48 = vadd.f32 %v696_v47, %v692_v46 }
 0xc9d   :  { %925 = vtanh.f32 %v698_v48 }
 0xca3   :  { %v926_v49 = vpop.eup %925 }
 0xca4   :  { %704 = vrot.lane.b32.xlu0 %v926_v49, %s935_s7 }
 0xd16   :  { %v705_v51 = vpop.permute.xlu0 %704 }
 0xd17   :  { %v707_v52 = vmul.f32 %v705_v51, %v701_v50 }
 0xd19   :  { %863 = vst.msk [vmem:[%s1333_s4 + $0xc] sm:$0x3] %vm135_vm6, %v707_v52  ;;  %866 = vmatmul.msk.f32.vlgmr.msrb.gmra.mxu2 %vm39_vm0, %v707_v52  ;;  %867 = vmatmul.msk.f32.vlgmr.msrb.gmra.mxu3 %vm39_vm0, %v707_v52 }
 0xd1a   :  { %864 = vst.msk [vmem:[%s1333_s4 + $0x2] sm:$0x3] %vm138_vm7, %v707_v52 }
 0xd9c   :  { %v752_v53 = vpop.f32.mrf.mxu3  ;;  %v732_v56 = vpop.f32.mrf.mxu2 }
 0xd9d   :  { %v757_v54 = vrot.slane %v752_v53, 6 }
 0xd9f   :  { %v758_v57 = vsel %vm86_vm1, %v732_v56, %v757_v54 }
 0xda0   :  { %v760_v58 = vadd.f32 %v865_v55, %v758_v57 }
 0xda2   :  { %781 = vrot.lane.b32.xlu1 %v760_v58, %s935_s7  ;;  %v868_v59 = vmul.f32 -1.442695, %v760_v58 }
 0xda4   :  { %927 = vpow2.f32 %v868_v59 }
 0xdaa   :  { %v928_v60 = vpop.eup %927 }
 0xdab   :  { %v764_v0 = vadd.f32 1.0, %v928_v60 }
 0xdad   :  { %929 = vrcp.f32 %v764_v0  ;;  %v776_v8 = vand.u32 2147483648, %v764_v0  ;;  %vm770_vm8 = vweird.f32 %v764_v0  ;;  %v774_v9 = vand.u32 2147483647, %v764_v0 }
 0xdaf   :  { %v777_v11 = vor.u32 1.1754944e-38, %v776_v8  ;;  %vm775_vm9 = vcmp.eq.f32.partialorder %v774_v9, 8.507059e+37 }
 0xdb3   :  { %v930_v1 = vpop.eup %929 }
 0xdb4   :  { %v766_v2 = vmul.f32 %v930_v1, %v764_v0  ;;  %vm771_vm0 = vweird.f32 %v930_v1 }
 0xdb5   :  { %vm772_vm1 = vmor %vm770_vm8, %vm771_vm0 }
 0xdb6   :  { %v767_v3 = vsub.f32 1.0, %v766_v2 }
 0xdb8   :  { %v768_v4 = vmul.f32 %v930_v1, %v767_v3 }
 0xdba   :  { %v769_v7 = vadd.f32 %v930_v1, %v768_v4 }
 0xdbc   :  { %v773_v10 = vsel %vm772_vm1, %v930_v1, %v769_v7 }
 0xdbd   :  { %v778_v13 = vsel %vm775_vm9, %v777_v11, %v773_v10 }
 0xdbe   :  { %v786_v15 = vmul.f32 %v778_v13, %v698_v48  ;;  %v795_v17 = vrot.slane %v778_v13, 2 }
 0xe14   :  { %v782_v5 = vpop.permute.xlu1 %781 }
 0xe15   :  { %v783_v6 = vrot.slane %v782_v5, 2 }
 0xe17   :  { %931 = vtanh.f32 %v783_v6 }
 0xe1d   :  { %v932_v12 = vpop.eup %931 }
 0xe1e   :  { %v787_v14 = vmul.f32 %v932_v12, %v778_v13 }
 0xe20   :  { %789 = vrot.lane.b32.xlu2 %v787_v14, %s935_s7 }
 0xe7a   :  { %v790_v61 = vpop.permute.xlu2 %789 }
 0xe7b   :  { %v792_v62 = vadd.f32 %v790_v61, %v786_v15 }
 0xe7d   :  { %933 = vtanh.f32 %v792_v62  ;;  %807 = vst [vmem:[#allocation1] ss:$4 sm:$0xff] %v792_v62 }
 0xe83   :  { %v934_v63 = vpop.eup %933 }
 0xe84   :  { %798 = vrot.lane.b32.xlu0 %v934_v63, %s935_s7  ;;  %v808_v16 = vld.sshfl [vmem:[#allocation1] sm:$0xff pattern:$0x73625140] }
 0xe85   :  { %809 = vrot.lane.b32.xlu1 %v808_v16, %s935_s7 }
 0xef6   :  { %v799_v18 = vpop.permute.xlu0 %798 }
 0xef7   :  { %v801_v19 = vmul.f32 %v799_v18, %v795_v17  ;;  %v810_v20 = vpop.permute.xlu1 %809 }
 0xef8   :  { %812 = vst.msk [vmem:[%s1334_s6] sm:$0x3] %vm804_vm10, %v810_v20 }
 0xef9   :  { %869 = vst.msk [vmem:[%s1333_s4 + $0xe] sm:$0x3] %vm135_vm6, %v801_v19 }
 0xefa   :  { %803 = vst.msk [vmem:[%s1333_s4] sm:$0x3] %vm138_vm7, %v801_v19 }
 0xefb   :  { %805 = vst.msk [vmem:[%s1335_s5] sm:$0x3] %vm804_vm10, %v801_v19 }

</bundles_post_ra>
